<compile_context>
chip_gen: v6e
topology: v6e:2x2x1
jax: 0.10.0
libtpu: 0.0.40
codegen_flags: <defaults>
</compile_context>

<pallas_src>
import random

import jax
import jax.numpy as jnp
from jax import lax
from jax.experimental import pallas as pl
from jax.experimental.pallas import tpu as pltpu


def _round_up(x, m):
    return ((x + m - 1) // m) * m


def _pad_rows(x, target_rows, value):
    pad = target_rows - x.shape[0]
    if pad == 0:
        return x
    filler = jnp.full((pad,) + x.shape[1:], value, x.dtype)
    return jnp.concatenate([x, filler], axis=0)


# --------------------------------------------------------------------------- #
# Phase 1: residual bottleneck adapter + L2 normalization (tiled over rows).
# --------------------------------------------------------------------------- #
def _adapter_norm_kernel(x_ref, w1_ref, w2_ref, ratio_ref, out_ref):
    ratio = ratio_ref[0, 0]
    x = x_ref[...]                                           # (TR, D) f32
    # Bottleneck MLP: bf16 operands -> MXU peak, f32 accumulation.
    h = jnp.maximum(
        jnp.dot(x.astype(jnp.bfloat16), w1_ref[...],
                preferred_element_type=jnp.float32), 0.0)
    a = jnp.maximum(
        jnp.dot(h.astype(jnp.bfloat16), w2_ref[...],
                preferred_element_type=jnp.float32), 0.0)
    # Residual mix + normalization stay in f32; rsqrt goes to the EUP (free slot).
    mixed = ratio * a + (1.0 - ratio) * x
    inv_norm = lax.rsqrt(jnp.sum(mixed * mixed, axis=1, keepdims=True))
    out_ref[...] = (mixed * inv_norm).astype(out_ref.dtype)


def _adapter_normalize(x, w1, w2, ratio, tr):
    rows, d = x.shape
    dh = w1.shape[1]
    flops = 4 * rows * d * dh + 8 * rows * d
    bytes_accessed = rows * d * (4 + 2) + 2 * d * dh * 2
    return pl.pallas_call(
        _adapter_norm_kernel,
        out_shape=jax.ShapeDtypeStruct((rows, d), jnp.bfloat16),
        grid=(rows // tr,),
        in_specs=[
            pl.BlockSpec((tr, d), lambda i: (i, 0)),
            pl.BlockSpec((d, dh), lambda i: (0, 0)),
            pl.BlockSpec((dh, d), lambda i: (0, 0)),
            pl.BlockSpec((1, 1), lambda i: (0, 0),
                         memory_space=pltpu.MemorySpace.SMEM),
        ],
        out_specs=pl.BlockSpec((tr, d), lambda i: (i, 0)),
        compiler_params=pltpu.CompilerParams(
            dimension_semantics=("parallel",)),
        cost_estimate=pl.CostEstimate(
            flops=int(flops), transcendentals=int(rows),
            bytes_accessed=int(bytes_accessed)),
    )(x, w1, w2, ratio)


# --------------------------------------------------------------------------- #
# Phase 2: tiled logits = img_n @ txt_n.T * exp(logit_scale) + logit_bias.
# --------------------------------------------------------------------------- #
def _logits_kernel(img_ref, txt_ref, scale_ref, bias_ref, out_ref):
    # A @ B^T via dot_general contracting the last dim of both operands (q@k^T
    # pattern): bf16 MXU operands, f32 accumulation, no materialized transpose.
    acc = lax.dot_general(
        img_ref[...], txt_ref[...],
        dimension_numbers=(((1,), (1,)), ((), ())),
        preferred_element_type=jnp.float32)
    out_ref[...] = acc * scale_ref[0, 0] + bias_ref[0, 0]


def _logits(img_n, txt_n, scale_exp, bias, tm, tn):
    n_pad, d = img_n.shape
    m_pad = txt_n.shape[0]
    flops = 2 * n_pad * m_pad * d + 2 * n_pad * m_pad
    bytes_accessed = n_pad * d * 2 + m_pad * d * 2 + n_pad * m_pad * 4
    return pl.pallas_call(
        _logits_kernel,
        out_shape=jax.ShapeDtypeStruct((n_pad, m_pad), jnp.float32),
        grid=(n_pad // tm, m_pad // tn),
        in_specs=[
            pl.BlockSpec((tm, d), lambda i, j: (i, 0)),
            pl.BlockSpec((tn, d), lambda i, j: (j, 0)),
            pl.BlockSpec((1, 1), lambda i, j: (0, 0),
                         memory_space=pltpu.MemorySpace.SMEM),
            pl.BlockSpec((1, 1), lambda i, j: (0, 0),
                         memory_space=pltpu.MemorySpace.SMEM),
        ],
        out_specs=pl.BlockSpec((tm, tn), lambda i, j: (i, j)),
        compiler_params=pltpu.CompilerParams(
            dimension_semantics=("parallel", "parallel")),
        cost_estimate=pl.CostEstimate(
            flops=int(flops), transcendentals=0,
            bytes_accessed=int(bytes_accessed)),
    )(img_n, txt_n, scale_exp, bias)


def sig_adapter_forward(image_features, text_features, params, caption_idx,
                        multi_positive=False, use_logit_bias=True):
    """Caption selection / squeeze / padding in plain JAX; hot path in Pallas."""
    img = jnp.asarray(image_features, jnp.float32)
    if img.ndim == 3:
        # `.squeeze()` in the PyTorch code; index axis 1 explicitly so N == 1 does not
        # collapse the batch dimension.
        img = img[:, 0, :]
    txt = jnp.asarray(text_features, jnp.float32)

    if not multi_positive:
        txt = txt[:, caption_idx, :]                                   # (N, D)
    else:
        txt = txt.reshape(txt.shape[0] * txt.shape[1], txt.shape[2])   # (N*C, D)

    if not use_logit_bias:
        # The PyTorch module returns the scalar 0 in this branch.
        return jnp.float32(0.0)

    n, _ = img.shape
    m = txt.shape[0]

    # Parameter transforms hoisted out of the kernels: exp(logit_scale), bf16 weights.
    ratio = jnp.asarray(params["residual_ratio"], jnp.float32).reshape(1, 1)
    scale_exp = jnp.exp(jnp.asarray(params["logit_scale"], jnp.float32)).reshape(1, 1)
    bias = jnp.asarray(params["logit_bias"], jnp.float32).reshape(1, 1)
    wi1 = jnp.asarray(params["img_w1"], jnp.bfloat16)
    wi2 = jnp.asarray(params["img_w2"], jnp.bfloat16)
    wt1 = jnp.asarray(params["txt_w1"], jnp.bfloat16)
    wt2 = jnp.asarray(params["txt_w2"], jnp.bfloat16)

    # Tile sizes: row tiles padded to multiples of 16 (bf16 sublane packing); output
    # columns padded to a multiple of 128 so the logits store is lane-dense
    # (unmasked vst — the single biggest measured lever for small kernels).
    tm = 256 if n > 256 else _round_up(n, 16)
    n_pad = _round_up(n, tm)
    tn = 256 if m > 256 else _round_up(m, 128)
    m_pad = _round_up(m, tn)

    # Pad with 1.0 (not 0.0) so padded rows keep a finite norm (no NaN); padded logits
    # are sliced off at the end.
    img_p = _pad_rows(img, n_pad, 1.0)
    txt_p = _pad_rows(txt, m_pad, 1.0)

    img_n = _adapter_normalize(img_p, wi1, wi2, ratio, tm)    # (n_pad, D) bf16
    txt_n = _adapter_normalize(txt_p, wt1, wt2, ratio, tn)    # (m_pad, D) bf16

    logits = _logits(img_n, txt_n, scale_exp, bias, tm, tn)
    return logits[:n, :m]


def reference_forward(image_features, text_features, params, caption_idx,
                      emulate_bf16=False):
    img = jnp.asarray(image_features, jnp.float32)[:, 0, :]
    txt = jnp.asarray(text_features, jnp.float32)[:, caption_idx, :]
    r = jnp.float32(params["residual_ratio"])

    def cast(x):
        return x.astype(jnp.bfloat16) if emulate_bf16 else x

    def mm(a, b):
        return jnp.dot(cast(a), cast(b), preferred_element_type=jnp.float32)

    def adapter(x, w1, w2):
        a = jnp.maximum(mm(jnp.maximum(mm(x, w1), 0.0), w2), 0.0)
        return r * a + (1.0 - r) * x

    img_a = adapter(img, params["img_w1"], params["img_w2"])
    txt_a = adapter(txt, params["txt_w1"], params["txt_w2"])
    img_n = img_a / jnp.linalg.norm(img_a, axis=1, keepdims=True)
    txt_n = txt_a / jnp.linalg.norm(txt_a, axis=1, keepdims=True)
    logits = mm(img_n, txt_n.T)
    return (logits * jnp.exp(jnp.float32(params["logit_scale"]))
            + jnp.float32(params["logit_bias"]))


if __name__ == "__main__":
    # Small, deterministic problem with hardware-friendly feature width:
    # N=16 samples, C=4 captions, D=256 features (2 full lanes), reduction=4 -> Dh=64.
    N, C, D, reduction = 16, 4, 256, 4
    Dh = D // reduction

    key = jax.random.PRNGKey(0)
    k_img, k_txt, k_wi1, k_wi2, k_wt1, k_wt2 = jax.random.split(key, 6)

    image_features = jax.random.normal(k_img, (N, 1, D), jnp.float32)  # squeeze -> (N, D)
    text_features = jax.random.normal(k_txt, (N, C, D), jnp.float32)

    params = {
        "img_w1": jax.random.normal(k_wi1, (D, Dh), jnp.float32) * 0.1,
        "img_w2": jax.random.normal(k_wi2, (Dh, D), jnp.float32) * 0.1,
        "txt_w1": jax.random.normal(k_wt1, (D, Dh), jnp.float32) * 0.1,
        "txt_w2": jax.random.normal(k_wt2, (Dh, D), jnp.float32) * 0.1,
        "residual_ratio": 0.5,          # initial_residual_ratio (frozen)
        "logit_scale": jnp.log(10.0),   # initial_logit_scale
        "logit_bias": -10.0,            # initial_bias
    }

    # Mirrors `c = random.randint(0, text_features.shape[1] - 1)` deterministically.
    random.seed(0)
    c = random.randint(0, C - 1)

    logits = sig_adapter_forward(image_features, text_features, params, c)
    logits = jax.block_until_ready(logits)
    assert logits.shape == (N, N)
    assert bool(jnp.all(jnp.isfinite(logits)))

    # Tight check vs. a reference that emulates the kernel's bf16 matmul operands.
    ref_bf16 = reference_forward(image_features, text_features, params, c,
                                 emulate_bf16=True)
    assert jnp.allclose(logits, ref_bf16, atol=5e-2, rtol=1e-2), (
        jnp.max(jnp.abs(logits - ref_bf16)))

    # Loose check vs. the pure-f32 PyTorch-equivalent reference (bf16 rounding drift).
    ref_f32 = reference_forward(image_features, text_features, params, c,
                                emulate_bf16=False)
    assert jnp.allclose(logits, ref_f32, atol=2e-1, rtol=0.0), (
        jnp.max(jnp.abs(logits - ref_f32)))

    print("KERNEL_OK")
</pallas_src>

<mosaic_0001>
module attributes {stable_mosaic.version = 11 : i64} {
  func.func @_adapter_norm_kernel(%arg0: i32, %arg1: memref<16x256xf32, #tpu.memory_space<vmem>>, %arg2: memref<256x64xbf16, #tpu.memory_space<vmem>>, %arg3: memref<64x256xbf16, #tpu.memory_space<vmem>>, %arg4: memref<1x1xf32, #tpu.memory_space<smem>>, %arg5: memref<16x256xbf16, #tpu.memory_space<vmem>>) attributes {dimension_semantics = [#tpu.dimension_semantics<parallel>], iteration_bounds = array<i64: 1>, scalar_prefetch = 0 : i64, scratch_operands = 0 : i64, tpu.core_type = #tpu.core_type<tc>, window_params = [{transform_indices = @transform_0, window_bounds = array<i64: 16, 256>}, {pipeline_mode = #tpu.pipeline_mode<synchronous>, transform_indices = @transform_1, window_bounds = array<i64: 256, 64>}, {pipeline_mode = #tpu.pipeline_mode<synchronous>, transform_indices = @transform_2, window_bounds = array<i64: 64, 256>}, {transform_indices = @transform_3, window_bounds = array<i64: 1, 1>}, {transform_indices = @transform_4, window_bounds = array<i64: 16, 256>}]} {
    %c0 = arith.constant 0 : index
    %c0_0 = arith.constant 0 : index
    %0 = memref.load %arg4[%c0, %c0_0] : memref<1x1xf32, #tpu.memory_space<smem>>
    %c0_1 = arith.constant 0 : index
    %c0_2 = arith.constant 0 : index
    %1 = vector.load %arg1[%c0_1, %c0_2] : memref<16x256xf32, #tpu.memory_space<vmem>>, vector<16x256xf32>
    %2 = arith.truncf %1 : vector<16x256xf32> to vector<16x256xbf16>
    %c0_3 = arith.constant 0 : index
    %c0_4 = arith.constant 0 : index
    %3 = vector.load %arg2[%c0_3, %c0_4] : memref<256x64xbf16, #tpu.memory_space<vmem>>, vector<256x64xbf16>
    %cst = arith.constant dense<0.000000e+00> : vector<16x64xf32>
    %4 = tpu.matmul %2, %3, %cst {dimension_numbers = #tpu.dot_dimension_numbers<[1], [0], [0], [1], [0, 0, 1, 1], [], []>} : vector<16x256xbf16>, vector<256x64xbf16>, vector<16x64xf32> -> vector<16x64xf32>
    %cst_5 = arith.constant 0.000000e+00 : f32
    %5 = vector.broadcast %cst_5 : f32 to vector<16x64xf32>
    %6 = arith.maximumf %4, %5 : vector<16x64xf32>
    %7 = arith.truncf %6 : vector<16x64xf32> to vector<16x64xbf16>
    %c0_6 = arith.constant 0 : index
    %c0_7 = arith.constant 0 : index
    %8 = vector.load %arg3[%c0_6, %c0_7] : memref<64x256xbf16, #tpu.memory_space<vmem>>, vector<64x256xbf16>
    %cst_8 = arith.constant dense<0.000000e+00> : vector<16x256xf32>
    %9 = tpu.matmul %7, %8, %cst_8 {dimension_numbers = #tpu.dot_dimension_numbers<[1], [0], [0], [1], [0, 0, 1, 1], [], []>} : vector<16x64xbf16>, vector<64x256xbf16>, vector<16x256xf32> -> vector<16x256xf32>
    %cst_9 = arith.constant 0.000000e+00 : f32
    %10 = vector.broadcast %cst_9 : f32 to vector<16x256xf32>
    %11 = arith.maximumf %9, %10 : vector<16x256xf32>
    %12 = vector.broadcast %0 : f32 to vector<16x256xf32>
    %13 = arith.mulf %12, %11 : vector<16x256xf32>
    %cst_10 = arith.constant 1.000000e+00 : f32
    %14 = arith.subf %cst_10, %0 : f32
    %15 = vector.broadcast %14 : f32 to vector<16x256xf32>
    %16 = arith.mulf %15, %1 : vector<16x256xf32>
    %17 = arith.addf %13, %16 : vector<16x256xf32>
    %18 = arith.mulf %17, %17 : vector<16x256xf32>
    %cst_11 = arith.constant dense<0.000000e+00> : vector<16xf32>
    %19 = vector.multi_reduction <add>, %18, %cst_11 [1] : vector<16x256xf32> to vector<16xf32>
    %20 = vector.shape_cast %19 : vector<16xf32> to vector<16x1xf32>
    %21 = math.rsqrt %20 : vector<16x1xf32>
    %22 = vector.broadcast %21 : vector<16x1xf32> to vector<16x256xf32>
    %23 = arith.mulf %17, %22 : vector<16x256xf32>
    %24 = arith.truncf %23 : vector<16x256xf32> to vector<16x256xbf16>
    %c0_12 = arith.constant 0 : index
    %c0_13 = arith.constant 0 : index
    %25 = vector.load %arg5[%c0_12, %c0_13] : memref<16x256xbf16, #tpu.memory_space<vmem>>, vector<16x256xbf16>
    tpu.vector_store %arg5[%c0_12, %c0_13], %24 {strides = array<i32>} : memref<16x256xbf16, #tpu.memory_space<vmem>>, vector<16x256xbf16>,
    return
  }
  func.func @transform_0(%arg0: i32) -> (i32, i32) {
    %c0_i32 = arith.constant 0 : i32
    %c0_i32_0 = arith.constant 0 : i32
    return %arg0, %c0_i32 : i32, i32
  }
  func.func @transform_1(%arg0: i32) -> (i32, i32) {
    %c0_i32 = arith.constant 0 : i32
    %c0_i32_0 = arith.constant 0 : i32
    %c0_i32_1 = arith.constant 0 : i32
    return %c0_i32, %c0_i32_0 : i32, i32
  }
  func.func @transform_2(%arg0: i32) -> (i32, i32) {
    %c0_i32 = arith.constant 0 : i32
    %c0_i32_0 = arith.constant 0 : i32
    %c0_i32_1 = arith.constant 0 : i32
    return %c0_i32, %c0_i32_0 : i32, i32
  }
  func.func @transform_3(%arg0: i32) -> (i32, i32) {
    %c0_i32 = arith.constant 0 : i32
    %c0_i32_0 = arith.constant 0 : i32
    %c0_i32_1 = arith.constant 0 : i32
    return %c0_i32, %c0_i32_0 : i32, i32
  }
  func.func @transform_4(%arg0: i32) -> (i32, i32) {
    %c0_i32 = arith.constant 0 : i32
    %c0_i32_0 = arith.constant 0 : i32
    return %arg0, %c0_i32 : i32, i32
  }
}

</mosaic_0001>

<bundles_post_ra>
// kernel: tpu_custom_call.1
= control target key start
LH: loop header
LB: loop body
LE: loop exit
PB: predicated region body
PF: predicated region fallthrough
CT: control target
= control target key end

     0   :  { %s594_s0 = inlined_call_operand.vmem [shape: f32[16,256], index: 0, kind: input, shape index: {}]   ;;  %s595_s1 = inlined_call_operand.vmem [shape: bf16[256,64], index: 1, kind: input, shape index: {}]   ;;  %s596_s2 = inlined_call_operand.vmem [shape: bf16[64,256], index: 2, kind: input, shape index: {}]   ;;  %s597_s3 = inlined_call_operand.<no memory space> [shape: f32[1,1], index: 3, kind: input, shape index: {}]   ;;  %s598_s4 = inlined_call_operand.hbm [shape: bf16[16,256], index: 4, kind: output, shape index: {}]  }
   0x1   :  { %v414_v0 = vld [vmem:[%s595_s1 + $0x78] sm:$0xff]   ;;  %v416_v2 = vld [vmem:[%s595_s1 + $0x70] sm:$0xff]   ;;  %v418_v4 = vld [vmem:[%s595_s1 + $0x68] sm:$0xff]  }
   0x2   :  { %v415_v1 = vld [vmem:[%s595_s1 + $0x38] sm:$0xff]   ;;  %388 = vmatprep.subr.bf16.mxu0 %v414_v0  ;;  %v417_v3 = vld [vmem:[%s595_s1 + $0x30] sm:$0xff]   ;;  %v419_v5 = vld [vmem:[%s595_s1 + $0x28] sm:$0xff]  }
   0x3   :  { %389 = vmatpush3.bf16.msra.mxu0 %v415_v1  ;;  %v420_v6 = vld [vmem:[%s595_s1 + $0x60] sm:$0xff]   ;;  %v422_v8 = vld [vmem:[%s595_s1 + $0x58] sm:$0xff]   ;;  %v424_v10 = vld [vmem:[%s595_s1 + $0x50] sm:$0xff]  }
   0x4   :  { %390 = vmatprep.subr.bf16.mxu0 %v416_v2  ;;  %v421_v7 = vld [vmem:[%s595_s1 + $0x20] sm:$0xff]   ;;  %v423_v9 = vld [vmem:[%s595_s1 + $0x18] sm:$0xff]   ;;  %v22_v11 = vld [vmem:[%s594_s0 + $0x8] sm:$0xff] }
   0x5   :  { %v536_v12 = vld [vmem:[%s594_s0 + $0x18] sm:$0xff]  ;;  %v425_v13 = vld [vmem:[%s595_s1 + $0x10] sm:$0xff]   ;;  %v426_v15 = vld [vmem:[%s595_s1 + $0x48] sm:$0xff]  }
   0x6   :  { %v26_v14 = vpack.c.bf16 %v536_v12, %v22_v11  ;;  %v430_v16 = vld [vmem:[%s596_s2 + $0x34] ss:$8 sps:$4 sm:$0xff]   ;;  %v432_v17 = vld [vmem:[%s596_s2 + $0x30] ss:$8 sps:$4 sm:$0xff]  }
   0x7   :  { %391 = vmatpush3.bf16.msra.mxu0 %v417_v3  ;;  %259 = vmatprep.subr.bf16.mxu1 %v430_v16 }
   0x8   :  { %392 = vmatprep.subr.bf16.mxu0 %v418_v4  ;;  %187 = vmatprep.mubr.bf16.mxu0 %v26_v14 }
   0xb   :  { %393 = vmatpush3.bf16.msra.mxu0 %v419_v5 }
   0xc   :  { %394 = vmatprep.subr.bf16.mxu0 %v420_v6 }
   0xf   :  { %395 = vmatpush3.bf16.msra.mxu0 %v421_v7 }
  0x10   :  { %396 = vmatprep.subr.bf16.mxu0 %v422_v8 }
  0x13   :  { %397 = vmatpush3.bf16.msra.mxu0 %v423_v9 }
  0x14   :  { %398 = vmatprep.subr.bf16.mxu0 %v424_v10 }
  0x15   :  { %10 = vsyncpa [#allocation4], 0  ;;  %260 = vmatpush1.bf16.msra.mxu1 %v432_v17  ;;  %v427_v18 = vld [vmem:[%s595_s1 + $0x8] sm:$0xff]   ;;  %v428_v19 = vld [vmem:[%s595_s1 + $0x40] sm:$0xff]   ;;  %v468_v30 = vmov 0   ;;  %vm247_vm0 = vcmask 523264   ;;  %v298_v42 = vstv %s597_s3 }
  0x16   :  { %v429_v20 = vld [vmem:[%s595_s1] sm:$0xff]   ;;  %v23_v22 = vld [vmem:[%s594_s0 + $0x10] sm:$0xff]  ;;  %283 = vmatprep.mubr.bf16.mxu1 %v468_v30  ;;  %s303_s19 = ssub.f32 1.0, %s597_s3  ;;  %s469_s3 = smov [#allocation3]  }
  0x17   :  { %399 = vmatpush3.bf16.msra.mxu0 %v425_v13  ;;  %v21_v21 = vld [vmem:[%s594_s0] sm:$0xff]  ;;  %v436_v26 = vld [vmem:[%s596_s2 + $0x14] ss:$8 sps:$4 sm:$0xff]   ;;  %v438_v27 = vld [vmem:[%s596_s2 + $0x10] ss:$8 sps:$4 sm:$0xff]   ;;  %s348_s21 = sshll.u32 %s469_s3, 4  ;;  %s349_s21 = int_to_ptr.vmem [resolvable:$true] %s348_s21 }
  0x18   :  { %400 = vmatprep.subr.bf16.mxu0 %v426_v15  ;;  %v25_v23 = vpack.c.bf16 %v23_v22, %v21_v21  ;;  %v433_v24 = vld [vmem:[%s596_s2 + $0x24] ss:$8 sps:$4 sm:$0xff]   ;;  %v435_v25 = vld [vmem:[%s596_s2 + $0x20] ss:$8 sps:$4 sm:$0xff]   ;;  %v304_v40 = vstv %s303_s19  ;;  %s446_s22 = scalar_lea.vmem %s349_s21, 256  ;;  %p451_p1 = scmp.lt.s32.totalorder %s349_s21, %s349_s21 }
  0x19   :  { %261 = vmatprep.subr.bf16.mxu1 %v433_v24  ;;  %v439_v28 = vld [vmem:[%s596_s2 + $0x4] ss:$8 sps:$4 sm:$0xff]   ;;  %v441_v29 = vld [vmem:[%s596_s2] ss:$8 sps:$4 sm:$0xff]   ;;  %v305_v44 = vmul.f32 %v304_v40, %v21_v21  ;;  %v306_v46 = vmul.f32 %v304_v40, %v22_v11  ;;  %v307_v50 = vmul.f32 %v304_v40, %v23_v22  ;;  %v308_v55 = vmul.f32 %v304_v40, %v536_v12  ;;  %p447_p0 = scmp.ne.s32.totalorder %s349_s21, %s446_s22  ;;  %p452_p2 = scmp.lt.s32.totalorder %s446_s22, %s446_s22 }
  0x1a   :  { %262 = vmatpush1.bf16.msra.mxu1 %v435_v25 }
  0x1b   :  { %401 = vmatpush3.bf16.msra.mxu0 %v427_v18  ;;  %263 = vmatprep.subr.bf16.mxu1 %v436_v26  ;;  %p453_p3 = por %p452_p2, %p451_p1 }
  0x1c   :  { %402 = vmatprep.subr.bf16.mxu0 %v428_v19 }
  0x1d   :  { %p454_p4 = pnand %p453_p3, %p447_p0 }
  0x1e   :  { %264 = vmatpush1.bf16.msra.mxu1 %v438_v27 }
  0x1f   :  { %403 = vmatpush3.bf16.msra.mxu0 %v429_v20  ;;  %265 = vmatprep.subr.bf16.mxu1 %v439_v28 }
  0x22   :  { %188 = vmatmul.mubr.bf16.vlgmr.msra.gmra.mxu0 %v25_v23  ;;  %266 = vmatpush1.bf16.msra.mxu1 %v441_v29 }
  0xe2   :  { %v404_v31 = vpop.f32.mrf.mxu0 }
  0xe4   :  { %v405_v32 = vpop.f32.mrf.mxu0 }
  0xe5   :  { %v406_v34 = vadd.f32 %v405_v32, %v404_v31 }
  0xe6   :  { %v407_v33 = vpop.f32.mrf.mxu0 }
  0xe7   :  { %v196_v37 = vmax.f32 %v406_v34, 0.0 }
  0xe8   :  { %v408_v35 = vpop.f32.mrf.mxu0 }
  0xe9   :  { %v409_v36 = vadd.f32 %v408_v35, %v407_v33 }
  0xeb   :  { %v197_v38 = vmax.f32 %v409_v36, 0.0 }
  0xed   :  { %v198_v39 = vpack.c.bf16 %v197_v38, %v196_v37 }
  0xef   :  { %383 = vmatmul.mubr.msk.bf16.vlgmr.msra.gmra.mxu1 %vm247_vm0, %v198_v39 }
 0x1af   :  { %v285_v41 = vpop.f32.mrf.mxu1 }
 0x1b0   :  { %v294_v43 = vmax.f32 %v285_v41, 0.0 }
 0x1b1   :  { %v287_v45 = vpop.f32.mrf.mxu1 }
 0x1b2   :  { %v299_v47 = vmul.f32 %v298_v42, %v294_v43  ;;  %v295_v48 = vmax.f32 %v287_v45, 0.0 }
 0x1b3   :  { %v289_v49 = vpop.f32.mrf.mxu1 }
 0x1b4   :  { %v300_v51 = vmul.f32 %v298_v42, %v295_v48  ;;  %v296_v52 = vmax.f32 %v289_v49, 0.0  ;;  %v309_v53 = vadd.f32 %v305_v44, %v299_v47 }
 0x1b5   :  { %v291_v54 = vpop.f32.mrf.mxu1 }
 0x1b6   :  { %v301_v56 = vmul.f32 %v298_v42, %v296_v52  ;;  %v297_v57 = vmax.f32 %v291_v54, 0.0  ;;  %v310_v58 = vadd.f32 %v306_v46, %v300_v51  ;;  %v313_v61 = vmul.f32 %v309_v53, %v309_v53 }
 0x1b8   :  { %v311_v59 = vadd.f32 %v307_v50, %v301_v56  ;;  %v302_v60 = vmul.f32 %v298_v42, %v297_v57  ;;  %v314_v62 = vmul.f32 %v310_v58, %v310_v58 }
 0x1ba   :  { %v312_v63 = vadd.f32 %v308_v55, %v302_v60  ;;  %v317_v0 = vadd.f32 %v314_v62, %v313_v61  ;;  %v315_v1 = vmul.f32 %v311_v59, %v311_v59 }
 0x1bc   :  { %318 = vadd.xlane.f32.xlu0 %v317_v0  ;;  %v316_v2 = vmul.f32 %v312_v63, %v312_v63 }
 0x1be   :  { %v320_v3 = vadd.f32 %v316_v2, %v315_v1 }
 0x1c0   :  { %321 = vadd.xlane.f32.xlu0 %v320_v3 }
 0x245   :  { %v319_v4 = vpop.xlane.xlu0 %318 }
 0x246   :  { %442 = vrsqrt.f32 %v319_v4 }
 0x249   :  { %v322_v5 = vpop.xlane.xlu0 %321 }
 0x24a   :  { %444 = vrsqrt.f32 %v322_v5 }
 0x253   :  { %v443_v6 = vpop.eup %442 }
 0x254   :  { %v325_v7 = vmul.f32 %v443_v6, %v309_v53  ;;  %v326_v8 = vmul.f32 %v443_v6, %v310_v58 }
 0x256   :  { %v386_v9 = vpack.c.bf16 %v326_v8, %v325_v7 }
 0x257   :  { %v445_v10 = vpop.eup %444 }
 0x258   :  { %v327_v11 = vmul.f32 %v445_v10, %v311_v59  ;;  %v328_v12 = vmul.f32 %v445_v10, %v312_v63  ;;  %341 = vst [vmem:[#allocation3] sm:$0xff] %v386_v9 }
 0x25a   :  { %v387_v13 = vpack.c.bf16 %v328_v12, %v327_v11 }
 0x25c   :  { %342 = vst [vmem:[#allocation3 + $0x8] sm:$0xff] %v387_v13 }
 0x25d   :  { %457 = shalt.err (!%p454_p4)
}
 0x25e   :  { %s470_s23 = smov 128   ;;  %s471_s24 = smov 8  }
 0x25f   :  { %354 = dma.vmem_to_hbm [thread:$0]  %s349_s21, 256, %s598_s4, [#allocation4], %s470_s23, %s470_s23, %s471_s24  }
 0x260   :  { %466 = dma.done.wait [#allocation4], 256  }
 0x261   :  { %467 = vsyncadd [#allocation4], 4294967040 }
 0x262   :  { %358 = vsyncpa [#allocation4], 1 }

</bundles_post_ra>
